<compile_context>
chip_gen: v7x
topology: tpu7x:2x2x1
jax: 0.10.0
libtpu: 0.0.40
codegen_flags: <defaults>
</compile_context>

<pallas_src>
import jax
import jax.numpy as jnp
from jax.experimental import pallas as pl
from jax.experimental.pallas import tpu as pltpu


def _round_up(x, m):
    return ((x + m - 1) // m) * m


def _ffn_kernel(x_ref, w1a_ref, b1a_ref, w1b_ref, b1b_ref, w2_ref, b2_ref,
                o_ref, acc_ref):
    k = pl.program_id(1)

    @pl.when(k == 0)
    def _():
        acc_ref[...] = jnp.zeros_like(acc_ref)

    x = x_ref[...]

    # fc1 for this d_ffn chunk: value half and gate half, f32 accumulation.
    xp = jnp.dot(x, w1a_ref[...], preferred_element_type=jnp.float32) + b1a_ref[...]
    g = jnp.dot(x, w1b_ref[...], preferred_element_type=jnp.float32) + b1b_ref[...]

    # SwiGLU in f32 (VPU/EUP work hides under the MXU); single downcast before fc2.
    act = xp * (g * jax.nn.sigmoid(g))
    # drop_int: identity in eval mode.

    # Partial fc2: accumulate this chunk's contribution into the f32 scratch.
    acc_ref[...] += jnp.dot(act.astype(w2_ref.dtype), w2_ref[...],
                            preferred_element_type=jnp.float32)

    @pl.when(k == pl.num_programs(1) - 1)
    def _():
        # drop_out: identity in eval mode.
        o_ref[...] = (acc_ref[...] + b2_ref[...]).astype(o_ref.dtype)


def lswt_feedforward(x, w1, b1, w2, b2, *, tm=256, tn=512,
                     compute_dtype=jnp.bfloat16):
    """x: [B, S, d_model]; w1: [d_model, 2*d_ffn]; b1: [2*d_ffn];
       w2: [d_ffn, d_model]; b2: [d_model].  Weights are stored transposed
       vs. torch.nn.Linear so the kernel computes y = x @ W + b directly."""
    B, S, d_model = x.shape
    two_d_ffn = w1.shape[1]
    d_ffn = two_d_ffn // 2
    M = B * S
    out_dtype = x.dtype

    assert tm % 8 == 0 and tn % 128 == 0

    # Padded sizes: rows to the row tile, features to lane multiples / tn.
    d_model_p = _round_up(d_model, 128)
    d_ffn_p = _round_up(d_ffn, 128)
    tn = min(tn, d_ffn_p)
    d_ffn_p = _round_up(d_ffn_p, tn)
    M_p = _round_up(M, tm)

    # Split fused fc1 weight into value / gate halves (no in-kernel slicing).
    w1a, w1b = w1[:, :d_ffn], w1[:, d_ffn:]
    b1a, b1b = b1[:d_ffn], b1[d_ffn:]

    # Zero-pad; padded gate columns give silu(0)=0 -> act=0, padded W2 rows are 0,
    # so padding contributes nothing.
    x2d = jnp.zeros((M_p, d_model_p), compute_dtype).at[:M, :d_model].set(
        x.reshape(M, d_model).astype(compute_dtype))
    w1a_p = jnp.zeros((d_model_p, d_ffn_p), compute_dtype).at[:d_model, :d_ffn].set(
        w1a.astype(compute_dtype))
    w1b_p = jnp.zeros((d_model_p, d_ffn_p), compute_dtype).at[:d_model, :d_ffn].set(
        w1b.astype(compute_dtype))
    w2_p = jnp.zeros((d_ffn_p, d_model_p), compute_dtype).at[:d_ffn, :d_model].set(
        w2.astype(compute_dtype))
    b1a_p = jnp.zeros((1, d_ffn_p), jnp.float32).at[0, :d_ffn].set(
        b1a.astype(jnp.float32))
    b1b_p = jnp.zeros((1, d_ffn_p), jnp.float32).at[0, :d_ffn].set(
        b1b.astype(jnp.float32))
    b2_p = jnp.zeros((1, d_model_p), jnp.float32).at[0, :d_model].set(
        b2.astype(jnp.float32))

    cbytes = jnp.dtype(compute_dtype).itemsize
    obytes = jnp.dtype(out_dtype).itemsize

    # Rough VMEM footprint (double-buffered inputs/outputs + f32 accumulator).
    vmem_est = (2 * tm * d_model_p * cbytes            # x
                + 2 * 2 * d_model_p * tn * cbytes      # w1a + w1b chunks
                + 2 * tn * d_model_p * cbytes          # w2 chunk
                + 2 * tm * d_model_p * obytes          # out
                + tm * d_model_p * 4                   # acc scratch
                + 2 * 2 * tn * 4 + 2 * d_model_p * 4)  # biases
    vmem_limit = min(int(vmem_est * 1.5) + (2 << 20), 120 << 20)

    cost = pl.CostEstimate(
        flops=6 * M_p * d_model_p * d_ffn_p,
        transcendentals=M_p * d_ffn_p,
        bytes_accessed=(M_p * d_model_p * (cbytes + obytes)
                        + 3 * d_model_p * d_ffn_p * cbytes
                        + (2 * d_ffn_p + d_model_p) * 4),
    )

    grid = (M_p // tm, d_ffn_p // tn)

    out2d = pl.pallas_call(
        _ffn_kernel,
        out_shape=jax.ShapeDtypeStruct((M_p, d_model_p), out_dtype),
        grid_spec=pltpu.PrefetchScalarGridSpec(
            num_scalar_prefetch=0,
            grid=grid,
            in_specs=[
                pl.BlockSpec((tm, d_model_p), lambda i, k: (i, 0)),   # x tile
                pl.BlockSpec((d_model_p, tn), lambda i, k: (0, k)),   # W1 value half
                pl.BlockSpec((1, tn), lambda i, k: (0, k)),           # b1 value half
                pl.BlockSpec((d_model_p, tn), lambda i, k: (0, k)),   # W1 gate half
                pl.BlockSpec((1, tn), lambda i, k: (0, k)),           # b1 gate half
                pl.BlockSpec((tn, d_model_p), lambda i, k: (k, 0)),   # W2 chunk
                pl.BlockSpec((1, d_model_p), lambda i, k: (0, 0)),    # b2
            ],
            out_specs=pl.BlockSpec((tm, d_model_p), lambda i, k: (i, 0)),
            scratch_shapes=[pltpu.VMEM((tm, d_model_p), jnp.float32)],
        ),
        compiler_params=pltpu.CompilerParams(
            dimension_semantics=("parallel", "arbitrary"),
            vmem_limit_bytes=vmem_limit,
        ),
        cost_estimate=cost,
    )(x2d, w1a_p, b1a_p, w1b_p, b1b_p, w2_p, b2_p)

    return out2d[:M, :d_model].reshape(B, S, d_model)


def reference_ffn(x, w1, b1, w2, b2):
    h = jnp.einsum("bsd,df->bsf", x, w1) + b1
    d_ffn = h.shape[-1] // 2
    xp, g = h[..., :d_ffn], h[..., d_ffn:]
    a = xp * (g * jax.nn.sigmoid(g))
    return jnp.einsum("bsf,fd->bsd", a, w2) + b2


if __name__ == "__main__":
    # Small config: batch=2, seq=8, d_model=32, d_ffn=64, gated_ffn=True
    B, S, D_MODEL, D_FFN = 2, 8, 32, 64

    key = jax.random.PRNGKey(0)
    kx, k1, kb1, k2, kb2 = jax.random.split(key, 5)

    x = jax.random.normal(kx, (B, S, D_MODEL), dtype=jnp.float32)
    # fc1: Linear(d_model, 2*d_ffn)  -> stored transposed: [d_model, 2*d_ffn]
    w1 = jax.random.normal(k1, (D_MODEL, 2 * D_FFN), dtype=jnp.float32) * 0.05
    b1 = jax.random.normal(kb1, (2 * D_FFN,), dtype=jnp.float32) * 0.05
    # fc2: Linear(d_ffn, d_model)    -> stored transposed: [d_ffn, d_model]
    w2 = jax.random.normal(k2, (D_FFN, D_MODEL), dtype=jnp.float32) * 0.05
    b2 = jax.random.normal(kb2, (D_MODEL,), dtype=jnp.float32) * 0.05

    ref = reference_ffn(x, w1, b1, w2, b2)

    # Strict check: f32 compute path.
    out_f32 = lswt_feedforward(x, w1, b1, w2, b2, compute_dtype=jnp.float32)
    out_f32 = jax.block_until_ready(out_f32)
    assert out_f32.shape == (B, S, D_MODEL)
    assert jnp.allclose(out_f32, ref, atol=1e-4, rtol=1e-4), "f32 mismatch vs reference"

    # Production path: bf16 inputs, f32 accumulation (looser tolerance vs f32 ref).
    out_bf16 = lswt_feedforward(x, w1, b1, w2, b2, compute_dtype=jnp.bfloat16)
    out_bf16 = jax.block_until_ready(out_bf16)
    assert out_bf16.shape == (B, S, D_MODEL)
    assert jnp.allclose(out_bf16, ref, atol=2e-2, rtol=2e-2), "bf16 mismatch vs reference"

    print("KERNEL_OK")
</pallas_src>

<mosaic_0001>
module attributes {stable_mosaic.version = 11 : i64} {
  func.func @_ffn_kernel(%arg0: i32, %arg1: i32, %arg2: memref<256x128xf32, #tpu.memory_space<vmem>>, %arg3: memref<128x128xf32, #tpu.memory_space<vmem>>, %arg4: memref<1x128xf32, #tpu.memory_space<vmem>>, %arg5: memref<128x128xf32, #tpu.memory_space<vmem>>, %arg6: memref<1x128xf32, #tpu.memory_space<vmem>>, %arg7: memref<128x128xf32, #tpu.memory_space<vmem>>, %arg8: memref<1x128xf32, #tpu.memory_space<vmem>>, %arg9: memref<256x128xf32, #tpu.memory_space<vmem>>, %arg10: memref<256x128xf32, #tpu.memory_space<vmem>>) attributes {dimension_semantics = [#tpu.dimension_semantics<parallel>, #tpu.dimension_semantics<arbitrary>], iteration_bounds = array<i64: 1, 1>, scalar_prefetch = 0 : i64, scratch_operands = 1 : i64, tpu.core_type = #tpu.core_type<tc>, window_params = [{transform_indices = @transform_0, window_bounds = array<i64: 256, 128>}, {transform_indices = @transform_1, window_bounds = array<i64: 128, 128>}, {transform_indices = @transform_2, window_bounds = array<i64: 1, 128>}, {transform_indices = @transform_3, window_bounds = array<i64: 128, 128>}, {transform_indices = @transform_4, window_bounds = array<i64: 1, 128>}, {transform_indices = @transform_5, window_bounds = array<i64: 128, 128>}, {pipeline_mode = #tpu.pipeline_mode<synchronous>, transform_indices = @transform_6, window_bounds = array<i64: 1, 128>}, {transform_indices = @transform_7, window_bounds = array<i64: 256, 128>}]} {
    %c0_i32 = arith.constant 0 : i32
    %0 = arith.cmpi eq, %arg1, %c0_i32 : i32
    %1 = arith.extui %0 : i1 to i32
    %c0_i32_0 = arith.constant 0 : i32
    %2 = arith.cmpi ne, %1, %c0_i32_0 : i32
    scf.if %2 {
      %cst_21 = arith.constant 0.000000e+00 : f32
      %29 = vector.broadcast %cst_21 : f32 to vector<256x128xf32>
      %c0_22 = arith.constant 0 : index
      %c0_23 = arith.constant 0 : index
      %30 = vector.load %arg10[%c0_22, %c0_23] : memref<256x128xf32, #tpu.memory_space<vmem>>, vector<256x128xf32>
      tpu.vector_store %arg10[%c0_22, %c0_23], %29 {strides = array<i32>} : memref<256x128xf32, #tpu.memory_space<vmem>>, vector<256x128xf32>,
    } else {
    }
    %c0 = arith.constant 0 : index
    %c0_1 = arith.constant 0 : index
    %3 = vector.load %arg2[%c0, %c0_1] : memref<256x128xf32, #tpu.memory_space<vmem>>, vector<256x128xf32>
    %c0_2 = arith.constant 0 : index
    %c0_3 = arith.constant 0 : index
    %4 = vector.load %arg3[%c0_2, %c0_3] : memref<128x128xf32, #tpu.memory_space<vmem>>, vector<128x128xf32>
    %cst = arith.constant dense<0.000000e+00> : vector<256x128xf32>
    %5 = tpu.matmul %3, %4, %cst {dimension_numbers = #tpu.dot_dimension_numbers<[1], [0], [0], [1], [0, 0, 1, 1], [], []>} : vector<256x128xf32>, vector<128x128xf32>, vector<256x128xf32> -> vector<256x128xf32>
    %c0_4 = arith.constant 0 : index
    %c0_5 = arith.constant 0 : index
    %6 = vector.load %arg4[%c0_4, %c0_5] : memref<1x128xf32, #tpu.memory_space<vmem>>, vector<1x128xf32>
    %7 = vector.broadcast %6 : vector<1x128xf32> to vector<256x128xf32>
    %8 = arith.addf %5, %7 : vector<256x128xf32>
    %c0_6 = arith.constant 0 : index
    %c0_7 = arith.constant 0 : index
    %9 = vector.load %arg5[%c0_6, %c0_7] : memref<128x128xf32, #tpu.memory_space<vmem>>, vector<128x128xf32>
    %cst_8 = arith.constant dense<0.000000e+00> : vector<256x128xf32>
    %10 = tpu.matmul %3, %9, %cst_8 {dimension_numbers = #tpu.dot_dimension_numbers<[1], [0], [0], [1], [0, 0, 1, 1], [], []>} : vector<256x128xf32>, vector<128x128xf32>, vector<256x128xf32> -> vector<256x128xf32>
    %c0_9 = arith.constant 0 : index
    %c0_10 = arith.constant 0 : index
    %11 = vector.load %arg6[%c0_9, %c0_10] : memref<1x128xf32, #tpu.memory_space<vmem>>, vector<1x128xf32>
    %12 = vector.broadcast %11 : vector<1x128xf32> to vector<256x128xf32>
    %13 = arith.addf %10, %12 : vector<256x128xf32>
    %14 = arith.negf %13 : vector<256x128xf32>
    %15 = math.exp %14 : vector<256x128xf32>
    %cst_11 = arith.constant 1.000000e+00 : f32
    %16 = vector.broadcast %cst_11 : f32 to vector<256x128xf32>
    %17 = arith.addf %16, %15 : vector<256x128xf32>
    %18 = arith.divf %16, %17 : vector<256x128xf32>
    %19 = arith.mulf %13, %18 : vector<256x128xf32>
    %20 = arith.mulf %8, %19 : vector<256x128xf32>
    %c0_12 = arith.constant 0 : index
    %c0_13 = arith.constant 0 : index
    %21 = vector.load %arg10[%c0_12, %c0_13] : memref<256x128xf32, #tpu.memory_space<vmem>>, vector<256x128xf32>
    %c0_14 = arith.constant 0 : index
    %c0_15 = arith.constant 0 : index
    %22 = vector.load %arg7[%c0_14, %c0_15] : memref<128x128xf32, #tpu.memory_space<vmem>>, vector<128x128xf32>
    %cst_16 = arith.constant dense<0.000000e+00> : vector<256x128xf32>
    %23 = tpu.matmul %20, %22, %cst_16 {dimension_numbers = #tpu.dot_dimension_numbers<[1], [0], [0], [1], [0, 0, 1, 1], [], []>} : vector<256x128xf32>, vector<128x128xf32>, vector<256x128xf32> -> vector<256x128xf32>
    %24 = arith.addf %21, %23 : vector<256x128xf32>
    %c0_17 = arith.constant 0 : index
    %c0_18 = arith.constant 0 : index
    %25 = vector.load %arg10[%c0_17, %c0_18] : memref<256x128xf32, #tpu.memory_space<vmem>>, vector<256x128xf32>
    tpu.vector_store %arg10[%c0_17, %c0_18], %24 {strides = array<i32>} : memref<256x128xf32, #tpu.memory_space<vmem>>, vector<256x128xf32>,
    %c0_i32_19 = arith.constant 0 : i32
    %26 = arith.cmpi eq, %arg1, %c0_i32_19 : i32
    %27 = arith.extui %26 : i1 to i32
    %c0_i32_20 = arith.constant 0 : i32
    %28 = arith.cmpi ne, %27, %c0_i32_20 : i32
    scf.if %28 {
      %c0_21 = arith.constant 0 : index
      %c0_22 = arith.constant 0 : index
      %29 = vector.load %arg10[%c0_21, %c0_22] : memref<256x128xf32, #tpu.memory_space<vmem>>, vector<256x128xf32>
      %c0_23 = arith.constant 0 : index
      %c0_24 = arith.constant 0 : index
      %30 = vector.load %arg8[%c0_23, %c0_24] : memref<1x128xf32, #tpu.memory_space<vmem>>, vector<1x128xf32>
      %31 = vector.broadcast %30 : vector<1x128xf32> to vector<256x128xf32>
      %32 = arith.addf %29, %31 : vector<256x128xf32>
      %c0_25 = arith.constant 0 : index
      %c0_26 = arith.constant 0 : index
      %33 = vector.load %arg9[%c0_25, %c0_26] : memref<256x128xf32, #tpu.memory_space<vmem>>, vector<256x128xf32>
      tpu.vector_store %arg9[%c0_25, %c0_26], %32 {strides = array<i32>} : memref<256x128xf32, #tpu.memory_space<vmem>>, vector<256x128xf32>,
    } else {
    }
    return
  }
  func.func @transform_0(%arg0: i32, %arg1: i32) -> (i32, i32) {
    %c0_i32 = arith.constant 0 : i32
    %c0_i32_0 = arith.constant 0 : i32
    return %arg0, %c0_i32 : i32, i32
  }
  func.func @transform_1(%arg0: i32, %arg1: i32) -> (i32, i32) {
    %c0_i32 = arith.constant 0 : i32
    %c0_i32_0 = arith.constant 0 : i32
    return %c0_i32, %arg1 : i32, i32
  }
  func.func @transform_2(%arg0: i32, %arg1: i32) -> (i32, i32) {
    %c0_i32 = arith.constant 0 : i32
    %c0_i32_0 = arith.constant 0 : i32
    return %c0_i32, %arg1 : i32, i32
  }
  func.func @transform_3(%arg0: i32, %arg1: i32) -> (i32, i32) {
    %c0_i32 = arith.constant 0 : i32
    %c0_i32_0 = arith.constant 0 : i32
    return %c0_i32, %arg1 : i32, i32
  }
  func.func @transform_4(%arg0: i32, %arg1: i32) -> (i32, i32) {
    %c0_i32 = arith.constant 0 : i32
    %c0_i32_0 = arith.constant 0 : i32
    return %c0_i32, %arg1 : i32, i32
  }
  func.func @transform_5(%arg0: i32, %arg1: i32) -> (i32, i32) {
    %c0_i32 = arith.constant 0 : i32
    %c0_i32_0 = arith.constant 0 : i32
    return %arg1, %c0_i32 : i32, i32
  }
  func.func @transform_6(%arg0: i32, %arg1: i32) -> (i32, i32) {
    %c0_i32 = arith.constant 0 : i32
    %c0_i32_0 = arith.constant 0 : i32
    %c0_i32_1 = arith.constant 0 : i32
    return %c0_i32, %c0_i32_0 : i32, i32
  }
  func.func @transform_7(%arg0: i32, %arg1: i32) -> (i32, i32) {
    %c0_i32 = arith.constant 0 : i32
    %c0_i32_0 = arith.constant 0 : i32
    return %arg0, %c0_i32 : i32, i32
  }
}

</mosaic_0001>

<bundles_post_ra>
// kernel: tpu_custom_call.1
= control target key start
LH: loop header
LB: loop body
LE: loop exit
PB: predicated region body
PF: predicated region fallthrough
CT: control target
= control target key end

     0   :  { %12 = vsyncpa [#allocation4], 0  ;;  %s2687_s0 = inlined_call_operand.hbm [shape: f32[256,128], index: 0, kind: input, shape index: {}]   ;;  %s2688_s1 = inlined_call_operand.hbm [shape: f32[128,128], index: 1, kind: input, shape index: {}]   ;;  %s2689_s2 = inlined_call_operand.vmem [shape: f32[1,128], index: 2, kind: input, shape index: {}]   ;;  %s2690_s3 = inlined_call_operand.hbm [shape: f32[128,128], index: 3, kind: input, shape index: {}]   ;;  %s2691_s4 = inlined_call_operand.vmem [shape: f32[1,128], index: 4, kind: input, shape index: {}]   ;;  %s2692_s5 = inlined_call_operand.hbm [shape: f32[128,128], index: 5, kind: input, shape index: {}]   ;;  %s2693_s6 = inlined_call_operand.vmem [shape: f32[1,128], index: 6, kind: input, shape index: {}]   ;;  %s2694_s7 = inlined_call_operand.hbm [shape: f32[256,128], index: 7, kind: output, shape index: {}]  }
   0x1   :  { %13 = vsyncpa [#allocation7], 0 }
   0x2   :  { %14 = vsyncpa [#allocation10], 0 }
   0x3   :  { %15 = vsyncpa [#allocation5], 0  ;;  %s2148_s24 = smov [#allocation6]   ;;  %s2149_s26 = smov [#allocation3]  }
   0x4   :  { %s33_s25 = sshll.u32 %s2148_s24, 4  ;;  %s21_s27 = sshll.u32 %s2149_s26, 4  ;;  %s34_s25 = int_to_ptr.vmem [resolvable:$true] %s33_s25  ;;  %s2195_s27 = int_to_ptr.vmem [resolvable:$true] %s21_s27 }
   0x5   :  { %s2030_s30 = scalar_lea.hbm %s2688_s1, 2048 }
   0x6   :  { %p2031_p0 = scmp.ne.s32.totalorder %s2688_s1, %s2030_s30  ;;  %p2034_p1 = scmp.lt.u32.totalorder %s2030_s30, %s2688_s1 }
   0x8   :  { %p2036_p2 = pnand %p2034_p1, %p2031_p0 }
   0xa   :  { %2039 = shalt.err (!%p2036_p2)
}
   0xb   :  { %s2040_s12 = scalar_lea.vmem %s34_s25, 2048  ;;  %p2045_p4 = scmp.lt.s32.totalorder %s34_s25, %s34_s25 }
   0xc   :  { %p2041_p3 = scmp.ne.s32.totalorder %s34_s25, %s2040_s12  ;;  %p2046_p5 = scmp.lt.s32.totalorder %s2040_s12, %s2040_s12 }
   0xe   :  { %p2047_p6 = por %p2046_p5, %p2045_p4 }
  0x10   :  { %p2048_p7 = pnand %p2047_p6, %p2041_p3 }
  0x12   :  { %2051 = shalt.err (!%p2048_p7)
}
  0x13   :  { %s2150_s13 = smov 128   ;;  %s2151_s14 = smov 8  }
  0x14   :  { %39 = dma.hbm_to_vmem [thread:$0]  %s2688_s1, 2048, %s34_s25, [#allocation7], %s2150_s13, %s2150_s13, %s2151_s14  }
  0x15   :  { %s2052_s19 = scalar_lea.hbm %s2687_s0, 4096 }
  0x16   :  { %p2053_p8 = scmp.ne.s32.totalorder %s2687_s0, %s2052_s19  ;;  %p2056_p9 = scmp.lt.u32.totalorder %s2052_s19, %s2687_s0 }
  0x18   :  { %p2058_p10 = pnand %p2056_p9, %p2053_p8 }
  0x1a   :  { %2061 = shalt.err (!%p2058_p10)
}
  0x1b   :  { %s2062_s24 = scalar_lea.vmem %s2195_s27, 4096  ;;  %p2067_p12 = scmp.lt.s32.totalorder %s2195_s27, %s2195_s27 }
  0x1c   :  { %p2063_p11 = scmp.ne.s32.totalorder %s2195_s27, %s2062_s24  ;;  %p2068_p13 = scmp.lt.s32.totalorder %s2062_s24, %s2062_s24 }
  0x1e   :  { %p2069_p0 = por %p2068_p13, %p2067_p12 }
  0x20   :  { %p2070_p1 = pnand %p2069_p0, %p2063_p11 }
  0x22   :  { %2073 = shalt.err (!%p2070_p1)
}
  0x23   :  { %27 = dma.hbm_to_vmem [thread:$0]  %s2687_s0, 4096, %s2195_s27, [#allocation4], %s2150_s13, %s2150_s13, %s2151_s14  }
  0x24   :  { %s2152_s26 = smov [#allocation8]   ;;  %s2153_s29 = smov [#allocation9]  }
  0x25   :  { %s47_s28 = sshll.u32 %s2152_s26, 4  ;;  %s61_s30 = sshll.u32 %s2153_s29, 4  ;;  %s48_s28 = int_to_ptr.vmem [resolvable:$true] %s47_s28  ;;  %s2232_s30 = int_to_ptr.vmem [resolvable:$true] %s61_s30 }
  0x26   :  { %s2074_s10 = scalar_lea.hbm %s2690_s3, 2048 }
  0x27   :  { %p2075_p2 = scmp.ne.s32.totalorder %s2690_s3, %s2074_s10  ;;  %p2078_p3 = scmp.lt.u32.totalorder %s2074_s10, %s2690_s3 }
  0x29   :  { %p2080_p4 = pnand %p2078_p3, %p2075_p2 }
  0x2b   :  { %2083 = shalt.err (!%p2080_p4)
}
  0x2c   :  { %s2084_s0 = scalar_lea.vmem %s48_s28, 2048  ;;  %p2089_p6 = scmp.lt.s32.totalorder %s48_s28, %s48_s28 }
  0x2d   :  { %p2085_p5 = scmp.ne.s32.totalorder %s48_s28, %s2084_s0  ;;  %p2090_p7 = scmp.lt.s32.totalorder %s2084_s0, %s2084_s0 }
  0x2f   :  { %p2091_p8 = por %p2090_p7, %p2089_p6 }
  0x31   :  { %p2092_p9 = pnand %p2091_p8, %p2085_p5 }
  0x33   :  { %2095 = shalt.err (!%p2092_p9)
}
  0x34   :  { %53 = dma.hbm_to_vmem [thread:$0]  %s2690_s3, 2048, %s48_s28, [#allocation7], %s2150_s13, %s2150_s13, %s2151_s14  }
  0x35   :  { %s2096_s20 = scalar_lea.hbm %s2692_s5, 2048 }
  0x36   :  { %p2097_p10 = scmp.ne.s32.totalorder %s2692_s5, %s2096_s20  ;;  %p2100_p11 = scmp.lt.u32.totalorder %s2096_s20, %s2692_s5 }
  0x38   :  { %p2102_p12 = pnand %p2100_p11, %p2097_p10 }
  0x3a   :  { %2105 = shalt.err (!%p2102_p12)
}
  0x3b   :  { %s2106_s1 = scalar_lea.vmem %s2232_s30, 2048  ;;  %p2111_p0 = scmp.lt.s32.totalorder %s2232_s30, %s2232_s30 }
  0x3c   :  { %p2107_p13 = scmp.ne.s32.totalorder %s2232_s30, %s2106_s1  ;;  %p2112_p1 = scmp.lt.s32.totalorder %s2106_s1, %s2106_s1 }
  0x3e   :  { %p2113_p2 = por %p2112_p1, %p2111_p0 }
  0x40   :  { %p2114_p3 = pnand %p2113_p2, %p2107_p13 }
  0x42   :  { %2117 = shalt.err (!%p2114_p3)
}
  0x43   :  { %67 = dma.hbm_to_vmem [thread:$0]  %s2692_s5, 2048, %s2232_s30, [#allocation10], %s2150_s13, %s2150_s13, %s2151_s14  }
  0x44   :  { %2140 = dma.done.wait [#allocation4], 4096  }
  0x45   :  { %2141 = vsyncadd [#allocation4], 4294963200 }
  0x46   :  { %2142 = dma.done.wait [#allocation7], 4096  }
  0x47   :  { %2143 = vsyncadd [#allocation7], 4294963200 }
  0x48   :  { %2144 = dma.done.wait [#allocation10], 2048  }
  0x49   :  { %2145 = vsyncadd [#allocation10], 4294965248  ;;  %v150_v0 = vld [vmem:[#allocation6] sm:$0xff]  ;;  %v151_v1 = vld [vmem:[#allocation6 + $0x8] sm:$0xff] }
  0x4a   :  { %v152_v2 = vld [vmem:[#allocation6 + $0x10] sm:$0xff]  ;;  %v1783_v3 = vpack.c.bf16 %v151_v1, %v150_v0  ;;  %v153_v4 = vld [vmem:[#allocation6 + $0x18] sm:$0xff]  ;;  %v154_v6 = vld [vmem:[#allocation6 + $0x20] sm:$0xff] }
  0x4b   :  { %v1787_v5 = vpack.c.bf16 %v153_v4, %v152_v2  ;;  %v155_v7 = vld [vmem:[#allocation6 + $0x28] sm:$0xff]  ;;  %v2269_v9 = vld [vmem:[#allocation3 + $0x80] sm:$0xff]  ;;  %v156_v10 = vld [vmem:[#allocation6 + $0x30] sm:$0xff] }
  0x4c   :  { %1879 = vmatprep.subr.bf16.mxu1 %v1783_v3  ;;  %1784 = vmatprep.subr.bf16.mxu0 %v1783_v3  ;;  %v1791_v8 = vpack.c.bf16 %v155_v7, %v154_v6  ;;  %v157_v11 = vld [vmem:[#allocation6 + $0x38] sm:$0xff]  ;;  %v158_v13 = vld [vmem:[#allocation6 + $0x40] sm:$0xff]  ;;  %v159_v14 = vld [vmem:[#allocation6 + $0x48] sm:$0xff] }
  0x4d   :  { %1887 = vmatpush3.bf16.msra.mxu1 %v1783_v3  ;;  %1786 = vmatpush3.bf16.msra.mxu0 %v1783_v3  ;;  %v1795_v12 = vpack.c.bf16 %v157_v11, %v156_v10  ;;  %v1799_v15 = vpack.c.bf16 %v159_v14, %v158_v13  ;;  %v160_v16 = vld [vmem:[#allocation6 + $0x50] sm:$0xff]  ;;  %v161_v17 = vld [vmem:[#allocation6 + $0x58] sm:$0xff]  ;;  %v2272_v19 = vld [vmem:[#allocation3] sm:$0xff] }
  0x4e   :  { %1880 = vmatprep.subr.bf16.mxu1 %v1787_v5  ;;  %1788 = vmatprep.subr.bf16.mxu0 %v1787_v5  ;;  %v1803_v18 = vpack.c.bf16 %v161_v17, %v160_v16  ;;  %v162_v20 = vld [vmem:[#allocation6 + $0x60] sm:$0xff]  ;;  %v163_v21 = vld [vmem:[#allocation6 + $0x68] sm:$0xff]  ;;  %v164_v23 = vld [vmem:[#allocation6 + $0x70] sm:$0xff] }
  0x4f   :  { %1599 = vmatprep.mubr.f32.mxu1 %v2269_v9  ;;  %1575 = vmatprep.mubr.f32.mxu0 %v2272_v19  ;;  %v1807_v22 = vpack.c.bf16 %v163_v21, %v162_v20  ;;  %v165_v24 = vld [vmem:[#allocation6 + $0x78] sm:$0xff]  ;;  %v398_v26 = vld [vmem:[#allocation8] sm:$0xff]  ;;  %v399_v27 = vld [vmem:[#allocation8 + $0x8] sm:$0xff] }
  0x50   :  { %v1811_v25 = vpack.c.bf16 %v165_v24, %v164_v23  ;;  %v1815_v28 = vpack.c.bf16 %v399_v27, %v398_v26  ;;  %v400_v29 = vld [vmem:[#allocation8 + $0x10] sm:$0xff]  ;;  %v401_v30 = vld [vmem:[#allocation8 + $0x18] sm:$0xff]  ;;  %v2275_v31 = vld [vmem:[#allocation3 + $0x88] sm:$0xff] }
  0x51   :  { %1888 = vmatpush3.bf16.msra.mxu1 %v1787_v5  ;;  %1790 = vmatpush3.bf16.msra.mxu0 %v1787_v5  ;;  %v2277_v32 = vld [vmem:[#allocation3 + $0x90] sm:$0xff]  ;;  %v1819_v33 = vpack.c.bf16 %v401_v30, %v400_v29  ;;  %v402_v34 = vld [vmem:[#allocation8 + $0x20] sm:$0xff]  ;;  %v403_v35 = vld [vmem:[#allocation8 + $0x28] sm:$0xff] }
  0x52   :  { %1881 = vmatprep.subr.bf16.mxu1 %v1791_v8  ;;  %1792 = vmatprep.subr.bf16.mxu0 %v1791_v8  ;;  %v2279_v36 = vld [vmem:[#allocation3 + $0x8] sm:$0xff]  ;;  %v2284_v37 = vld [vmem:[#allocation3 + $0x98] sm:$0xff]  ;;  %v2286_v38 = vld [vmem:[#allocation3 + $0x10] sm:$0xff]  ;;  %v1823_v40 = vpack.c.bf16 %v403_v35, %v402_v34 }
  0x53   :  { %v2288_v39 = vld [vmem:[#allocation3 + $0xa0] sm:$0xff]  ;;  %v404_v41 = vld [vmem:[#allocation8 + $0x30] sm:$0xff]  ;;  %v405_v42 = vld [vmem:[#allocation8 + $0x38] sm:$0xff] }
  0x54   :  { %v2291_v43 = vld [vmem:[#allocation3 + $0x18] sm:$0xff]  ;;  %v2296_v44 = vld [vmem:[#allocation3 + $0xa8] sm:$0xff]  ;;  %v2298_v45 = vld [vmem:[#allocation3 + $0x20] sm:$0xff]  ;;  %v1827_v47 = vpack.c.bf16 %v405_v42, %v404_v41 }
  0x55   :  { %1889 = vmatpush3.bf16.msra.mxu1 %v1791_v8  ;;  %1794 = vmatpush3.bf16.msra.mxu0 %v1791_v8  ;;  %v2300_v46 = vld [vmem:[#allocation3 + $0xb0] sm:$0xff]  ;;  %v406_v48 = vld [vmem:[#allocation8 + $0x40] sm:$0xff]  ;;  %v407_v49 = vld [vmem:[#allocation8 + $0x48] sm:$0xff] }
  0x56   :  { %1882 = vmatprep.subr.bf16.mxu1 %v1795_v12  ;;  %1796 = vmatprep.subr.bf16.mxu0 %v1795_v12  ;;  %v2303_v50 = vld [vmem:[#allocation3 + $0x28] sm:$0xff]  ;;  %v2308_v51 = vld [vmem:[#allocation3 + $0xb8] sm:$0xff]  ;;  %v124_v52 = vld [vmem:[#allocation3 + $0x30] sm:$0xff]  ;;  %v1831_v54 = vpack.c.bf16 %v407_v49, %v406_v48 }
  0x57   :  { %v2310_v53 = vld [vmem:[#allocation3 + $0xc0] sm:$0xff]  ;;  %v408_v55 = vld [vmem:[#allocation8 + $0x50] sm:$0xff]  ;;  %v409_v56 = vld [vmem:[#allocation8 + $0x58] sm:$0xff] }
  0x58   :  { %v125_v57 = vld [vmem:[#allocation3 + $0x38] sm:$0xff]  ;;  %v2314_v58 = vld [vmem:[#allocation3 + $0xc8] sm:$0xff]  ;;  %v126_v59 = vld [vmem:[#allocation3 + $0x40] sm:$0xff]  ;;  %v1835_v61 = vpack.c.bf16 %v409_v56, %v408_v55 }
  0x59   :  { %1890 = vmatpush3.bf16.msra.mxu1 %v1795_v12  ;;  %1798 = vmatpush3.bf16.msra.mxu0 %v1795_v12  ;;  %v2316_v60 = vld [vmem:[#allocation3 + $0xd0] sm:$0xff]  ;;  %v410_v62 = vld [vmem:[#allocation8 + $0x60] sm:$0xff]  ;;  %v411_v63 = vld [vmem:[#allocation8 + $0x68] sm:$0xff] }
  0x5a   :  { %1883 = vmatprep.subr.bf16.mxu1 %v1799_v15  ;;  %1800 = vmatprep.subr.bf16.mxu0 %v1799_v15  ;;  %v127_v0 = vld [vmem:[#allocation3 + $0x48] sm:$0xff]  ;;  %v145_v1 = vld [vmem:[#allocation3 + $0xd8] sm:$0xff]  ;;  %v128_v2 = vld [vmem:[#allocation3 + $0x50] sm:$0xff]  ;;  %v1839_v4 = vpack.c.bf16 %v411_v63, %v410_v62 }
  0x5b   :  { %v146_v3 = vld [vmem:[#allocation3 + $0xe0] sm:$0xff]  ;;  %v412_v5 = vld [vmem:[#allocation8 + $0x70] sm:$0xff]  ;;  %v413_v6 = vld [vmem:[#allocation8 + $0x78] sm:$0xff] }
  0x5c   :  { %v129_v7 = vld [vmem:[#allocation3 + $0x58] sm:$0xff]  ;;  %v147_v8 = vld [vmem:[#allocation3 + $0xe8] sm:$0xff]  ;;  %v130_v10 = vld [vmem:[#allocation3 + $0x60] sm:$0xff]  ;;  %v1843_v12 = vpack.c.bf16 %v413_v6, %v412_v5 }
  0x5d   :  { %1891 = vmatpush3.bf16.msra.mxu1 %v1799_v15  ;;  %1802 = vmatpush3.bf16.msra.mxu0 %v1799_v15  ;;  %v148_v11 = vld [vmem:[#allocation3 + $0xf0] sm:$0xff]  ;;  %v131_v13 = vld [vmem:[#allocation3 + $0x68] sm:$0xff]  ;;  %v149_v14 = vld [vmem:[#allocation3 + $0xf8] sm:$0xff] }
  0x5e   :  { %1884 = vmatprep.subr.bf16.mxu1 %v1803_v18  ;;  %1804 = vmatprep.subr.bf16.mxu0 %v1803_v18  ;;  %v132_v15 = vld [vmem:[#allocation3 + $0x70] sm:$0xff]  ;;  %v133_v16 = vld [vmem:[#allocation3 + $0x78] sm:$0xff]  ;;  %v935_v17 = vld [vmem:[#allocation9 + $0x8] sm:$0xff] }
  0x5f   :  { %v937_v20 = vld [vmem:[#allocation9 + $0x18] sm:$0xff]  ;;  %v939_v23 = vld [vmem:[#allocation9 + $0x28] sm:$0xff]  ;;  %v946_v34 = vld [vmem:[#allocation9 + $0x60] sm:$0xff] }
  0x60   :  { %v941_v26 = vld [vmem:[#allocation9 + $0x38] sm:$0xff]  ;;  %v943_v29 = vld [vmem:[#allocation9 + $0x48] sm:$0xff] }
  0x61   :  { %1892 = vmatpush3.bf16.msra.mxu1 %v1803_v18  ;;  %1806 = vmatpush3.bf16.msra.mxu0 %v1803_v18  ;;  %v947_v35 = vld [vmem:[#allocation9 + $0x68] sm:$0xff] }
  0x62   :  { %1885 = vmatprep.subr.bf16.mxu1 %v1807_v22  ;;  %1808 = vmatprep.subr.bf16.mxu0 %v1807_v22 }
  0x65   :  { %1893 = vmatpush3.bf16.msra.mxu1 %v1807_v22  ;;  %1810 = vmatpush3.bf16.msra.mxu0 %v1807_v22  ;;  %v938_v22 = vld [vmem:[#allocation9 + $0x20] sm:$0xff] }
  0x66   :  { %1886 = vmatprep.subr.bf16.mxu1 %v1811_v25  ;;  %1812 = vmatprep.subr.bf16.mxu0 %v1811_v25  ;;  %v1855_v24 = vpack.c.bf16 %v939_v23, %v938_v22 }
  0x69   :  { %1894 = vmatpush3.bf16.msra.mxu1 %v1811_v25  ;;  %1814 = vmatpush3.bf16.msra.mxu0 %v1811_v25  ;;  %v940_v25 = vld [vmem:[#allocation9 + $0x30] sm:$0xff] }
  0x6a   :  { %1816 = vmatprep.subr.bf16.mxu1 %v1815_v28  ;;  %v1859_v27 = vpack.c.bf16 %v941_v26, %v940_v25 }
  0x6c   :  { %1600 = vmatmul.mubr.f32.vlgmr.msra.gmra.mrb[0].mxu1 %v2275_v31  ;;  %1576 = vmatmul.mubr.f32.vlgmr.msra.gmra.mrb[0].mxu0 %v2279_v36 }
  0x6d   :  { %1818 = vmatpush3.bf16.msra.mxu1 %v1815_v28  ;;  %1602 = vmatprep.mubr.f32.mxu1 %v2277_v32  ;;  %v942_v28 = vld [vmem:[#allocation9 + $0x40] sm:$0xff] }
  0x6e   :  { %1820 = vmatprep.subr.bf16.mxu1 %v1819_v33  ;;  %1578 = vmatprep.mubr.f32.mxu0 %v2286_v38  ;;  %v1863_v30 = vpack.c.bf16 %v943_v29, %v942_v28 }
  0x70   :  { %1603 = vmatmul.mubr.f32.gmra.mrb[2].mxu1 %v2284_v37  ;;  %1579 = vmatmul.mubr.f32.gmra.mrb[2].mxu0 %v2291_v43 }
  0x71   :  { %1822 = vmatpush3.bf16.msra.mxu1 %v1819_v33  ;;  %1605 = vmatprep.mubr.f32.mxu1 %v2288_v39 }
  0x72   :  { %1824 = vmatprep.subr.bf16.mxu1 %v1823_v40  ;;  %1581 = vmatprep.mubr.f32.mxu0 %v2298_v45 }
  0x74   :  { %1606 = vmatmul.mubr.f32.gmra.mrb[4].mxu1 %v2296_v44  ;;  %1582 = vmatmul.mubr.f32.gmra.mrb[4].mxu0 %v2303_v50 }
  0x75   :  { %1826 = vmatpush3.bf16.msra.mxu1 %v1823_v40  ;;  %1608 = vmatprep.mubr.f32.mxu1 %v2300_v46 }
  0x76   :  { %1828 = vmatprep.subr.bf16.mxu1 %v1827_v47  ;;  %1584 = vmatprep.mubr.f32.mxu0 %v124_v52 }
  0x78   :  { %1609 = vmatmul.mubr.f32.gmra.mrb[6].mxu1 %v2308_v51  ;;  %1585 = vmatmul.mubr.f32.gmra.mrb[6].mxu0 %v125_v57 }
  0x79   :  { %1830 = vmatpush3.bf16.msra.mxu1 %v1827_v47  ;;  %1611 = vmatprep.mubr.f32.mxu1 %v2310_v53 }
  0x7a   :  { %1832 = vmatprep.subr.bf16.mxu1 %v1831_v54  ;;  %1587 = vmatprep.mubr.f32.mxu0 %v126_v59 }
  0x7c   :  { %1612 = vmatmul.mubr.f32.gmra.mrb[8].mxu1 %v2314_v58  ;;  %1588 = vmatmul.mubr.f32.gmra.mrb[8].mxu0 %v127_v0 }
  0x7d   :  { %1834 = vmatpush3.bf16.msra.mxu1 %v1831_v54  ;;  %1614 = vmatprep.mubr.f32.mxu1 %v2316_v60 }
  0x7e   :  { %1836 = vmatprep.subr.bf16.mxu1 %v1835_v61  ;;  %1590 = vmatprep.mubr.f32.mxu0 %v128_v2 }
  0x80   :  { %1615 = vmatmul.mubr.f32.gmra.mrb[10].mxu1 %v145_v1  ;;  %1591 = vmatmul.mubr.f32.gmra.mrb[10].mxu0 %v129_v7 }
  0x81   :  { %1838 = vmatpush3.bf16.msra.mxu1 %v1835_v61  ;;  %1617 = vmatprep.mubr.f32.mxu1 %v146_v3 }
  0x82   :  { %1840 = vmatprep.subr.bf16.mxu1 %v1839_v4  ;;  %1593 = vmatprep.mubr.f32.mxu0 %v130_v10 }
  0x84   :  { %1618 = vmatmul.mubr.f32.gmra.mrb[12].mxu1 %v147_v8  ;;  %1594 = vmatmul.mubr.f32.gmra.mrb[12].mxu0 %v131_v13 }
  0x85   :  { %1842 = vmatpush3.bf16.msra.mxu1 %v1839_v4  ;;  %1620 = vmatprep.mubr.f32.mxu1 %v148_v11  ;;  %v2396_v4 = vld [vmem:[%s2689_s2] ss:$0 sm:$0xff] }
  0x86   :  { %1844 = vmatprep.subr.bf16.mxu1 %v1843_v12  ;;  %1596 = vmatprep.mubr.f32.mxu0 %v132_v15 }
  0x88   :  { %1621 = vmatmul.mubr.f32.gmra.mrb[14].mxu1 %v149_v14  ;;  %1597 = vmatmul.mubr.f32.gmra.mrb[14].mxu0 %v133_v16 }
  0x89   :  { %1846 = vmatpush3.bf16.msra.mxu1 %v1843_v12  ;;  %1655 = vmatprep.mubr.f32.mxu1 %v2272_v19  ;;  %v936_v19 = vld [vmem:[#allocation9 + $0x10] sm:$0xff] }
  0x8a   :  { %v1851_v21 = vpack.c.bf16 %v937_v20, %v936_v19 }
  0x8c   :  { %1656 = vmatmul.mubr.f32.vlgmr.msra.gmra.mrb[16].mxu1 %v2279_v36  ;;  %v1871_v36 = vpack.c.bf16 %v947_v35, %v946_v34 }
  0x8d   :  { %1658 = vmatprep.mubr.f32.mxu1 %v2286_v38  ;;  %v949_v38 = vld [vmem:[#allocation9 + $0x78] sm:$0xff] }
  0x90   :  { %1659 = vmatmul.mubr.f32.gmra.mrb[18].mxu1 %v2291_v43 }
  0x91   :  { %1661 = vmatprep.mubr.f32.mxu1 %v2298_v45 }
  0x94   :  { %1662 = vmatmul.mubr.f32.gmra.mrb[20].mxu1 %v2303_v50 }
  0x95   :  { %1664 = vmatprep.mubr.f32.mxu1 %v124_v52 }
  0x98   :  { %1665 = vmatmul.mubr.f32.gmra.mrb[22].mxu1 %v125_v57 }
  0x99   :  { %1667 = vmatprep.mubr.f32.mxu1 %v126_v59 }
  0x9c   :  { %1668 = vmatmul.mubr.f32.gmra.mrb[24].mxu1 %v127_v0 }
  0x9d   :  { %1670 = vmatprep.mubr.f32.mxu1 %v128_v2 }
  0xa0   :  { %1671 = vmatmul.mubr.f32.gmra.mrb[26].mxu1 %v129_v7 }
  0xa1   :  { %1673 = vmatprep.mubr.f32.mxu1 %v130_v10 }
  0xa4   :  { %1674 = vmatmul.mubr.f32.gmra.mrb[28].mxu1 %v131_v13 }
  0xa5   :  { %1676 = vmatprep.mubr.f32.mxu1 %v132_v15 }
  0xa8   :  { %1677 = vmatmul.mubr.f32.gmra.mrb[30].mxu1 %v133_v16 }
  0xa9   :  { %1679 = vmatprep.mubr.f32.mxu1 %v2269_v9  ;;  %v934_v9 = vld [vmem:[#allocation9] sm:$0xff] }
  0xaa   :  { %v1847_v18 = vpack.c.bf16 %v935_v17, %v934_v9 }
  0xac   :  { %1680 = vmatmul.mubr.f32.gmra.mrb[32].mxu1 %v2275_v31  ;;  %1848 = vmatprep.subr.bf16.mxu0 %v1847_v18  ;;  %v944_v31 = vld [vmem:[#allocation9 + $0x50] sm:$0xff] }
  0xad   :  { %1682 = vmatprep.mubr.f32.mxu1 %v2277_v32  ;;  %1850 = vmatpush3.bf16.msra.mxu0 %v1847_v18  ;;  %v945_v32 = vld [vmem:[#allocation9 + $0x58] sm:$0xff] }
  0xae   :  { %1852 = vmatprep.subr.bf16.mxu0 %v1851_v21  ;;  %v1867_v33 = vpack.c.bf16 %v945_v32, %v944_v31 }
  0xb0   :  { %1683 = vmatmul.mubr.f32.gmra.mrb[34].mxu1 %v2284_v37  ;;  %v948_v37 = vld [vmem:[#allocation9 + $0x70] sm:$0xff] }
  0xb1   :  { %1685 = vmatprep.mubr.f32.mxu1 %v2288_v39  ;;  %1854 = vmatpush3.bf16.msra.mxu0 %v1851_v21  ;;  %v1875_v39 = vpack.c.bf16 %v949_v38, %v948_v37 }
  0xb2   :  { %1856 = vmatprep.subr.bf16.mxu0 %v1855_v24 }
  0xb4   :  { %1686 = vmatmul.mubr.f32.gmra.mrb[36].mxu1 %v2296_v44 }
  0xb5   :  { %1688 = vmatprep.mubr.f32.mxu1 %v2300_v46  ;;  %1858 = vmatpush3.bf16.msra.mxu0 %v1855_v24 }
  0xb6   :  { %1860 = vmatprep.subr.bf16.mxu0 %v1859_v27 }
  0xb8   :  { %1689 = vmatmul.mubr.f32.gmra.mrb[38].mxu1 %v2308_v51 }
  0xb9   :  { %1691 = vmatprep.mubr.f32.mxu1 %v2310_v53  ;;  %1862 = vmatpush3.bf16.msra.mxu0 %v1859_v27 }
  0xba   :  { %1864 = vmatprep.subr.bf16.mxu0 %v1863_v30 }
  0xbc   :  { %1692 = vmatmul.mubr.f32.gmra.mrb[40].mxu1 %v2314_v58 }
  0xbd   :  { %1694 = vmatprep.mubr.f32.mxu1 %v2316_v60  ;;  %1866 = vmatpush3.bf16.msra.mxu0 %v1863_v30 }
  0xbe   :  { %1868 = vmatprep.subr.bf16.mxu0 %v1867_v33 }
  0xc0   :  { %1695 = vmatmul.mubr.f32.gmra.mrb[42].mxu1 %v145_v1 }
  0xc1   :  { %1697 = vmatprep.mubr.f32.mxu1 %v146_v3  ;;  %1870 = vmatpush3.bf16.msra.mxu0 %v1867_v33 }
  0xc2   :  { %1872 = vmatprep.subr.bf16.mxu0 %v1871_v36 }
  0xc4   :  { %1698 = vmatmul.mubr.f32.gmra.mrb[44].mxu1 %v147_v8 }
  0xc5   :  { %1700 = vmatprep.mubr.f32.mxu1 %v148_v11  ;;  %1874 = vmatpush3.bf16.msra.mxu0 %v1871_v36  ;;  %v2410_v11 = vld [vmem:[%s2691_s4] ss:$0 sm:$0xff] }
  0xc6   :  { %1876 = vmatprep.subr.bf16.mxu0 %v1875_v39 }
  0xc8   :  { %1701 = vmatmul.mubr.f32.gmra.mrb[46].mxu1 %v149_v14 }
  0xc9   :  { %1878 = vmatpush3.bf16.msra.mxu0 %v1875_v39 }
 0x13f   :  { %v2337_v40 = vpop.f32.mrb[0].mxu1  ;;  %v2339_v41 = vpop.f32.mrb[0].mxu0 }
 0x140   :  { %v2341_v42 = vpop.f32.mrb[1].mxu1  ;;  %v2343_v43 = vpop.f32.mrb[1].mxu0 }
 0x143   :  { %v2345_v44 = vpop.f32.mrb[2].mxu1  ;;  %v2347_v45 = vpop.f32.mrb[2].mxu0 }
 0x144   :  { %v2349_v46 = vpop.f32.mrb[3].mxu1  ;;  %v2351_v47 = vpop.f32.mrb[3].mxu0 }
 0x147   :  { %v2353_v48 = vpop.f32.mrb[4].mxu1  ;;  %v2355_v49 = vpop.f32.mrb[4].mxu0 }
 0x148   :  { %v2357_v50 = vpop.f32.mrb[5].mxu1  ;;  %v2359_v51 = vpop.f32.mrb[5].mxu0 }
 0x14b   :  { %v2361_v52 = vpop.f32.mrb[6].mxu1  ;;  %v2363_v53 = vpop.f32.mrb[6].mxu0 }
 0x14c   :  { %v2365_v54 = vpop.f32.mrb[7].mxu1  ;;  %v2367_v55 = vpop.f32.mrb[7].mxu0 }
 0x14f   :  { %v2369_v56 = vpop.f32.mrb[8].mxu1  ;;  %v2371_v57 = vpop.f32.mrb[8].mxu0 }
 0x150   :  { %v2373_v58 = vpop.f32.mrb[9].mxu1  ;;  %v2375_v59 = vpop.f32.mrb[9].mxu0 }
 0x153   :  { %v2377_v60 = vpop.f32.mrb[10].mxu1  ;;  %v2379_v61 = vpop.f32.mrb[10].mxu0 }
 0x154   :  { %v2381_v62 = vpop.f32.mrb[11].mxu1  ;;  %v2383_v63 = vpop.f32.mrb[11].mxu0 }
 0x157   :  { %v2385_v0 = vpop.f32.mrb[12].mxu1  ;;  %v2387_v1 = vpop.f32.mrb[12].mxu0 }
 0x158   :  { %v2389_v2 = vpop.f32.mrb[13].mxu1  ;;  %v2391_v3 = vpop.f32.mrb[13].mxu0 }
 0x15b   :  { %v1622_v5 = vpop.f32.mrb[14].mxu1  ;;  %v2398_v6 = vpop.f32.mrb[14].mxu0 }
 0x15c   :  { %v2401_v7 = vadd.f32 %v1622_v5, %v2396_v4  ;;  %v2403_v8 = vpop.f32.mrb[15].mxu1  ;;  %v2405_v10 = vpop.f32.mrb[15].mxu0 }
 0x15d   :  { %2696 = vst [vmem:[#allocation17_spill] sm:$0xff] %v2403_v8 }
 0x15e   :  { %2695 = vst [vmem:[#allocation16_spill] sm:$0xff] %v2401_v7 }
 0x15f   :  { %v1657_v12 = vpop.f32.mrb[16].mxu1 }
 0x160   :  { %v2413_v13 = vadd.f32 %v1657_v12, %v2410_v11  ;;  %v487_v14 = vpop.f32.mrb[17].mxu1 }
 0x161   :  { %v2416_v15 = vadd.f32 %v2410_v11, %v487_v14 }
 0x162   :  { %v1367_v16 = vmul.f32 -1.442695, %v2413_v13 }
 0x163   :  { %v1366_v9 = vmul.f32 -1.442695, %v2416_v15  ;;  %v1660_v17 = vpop.f32.mrb[18].mxu1 }
 0x164   :  { %1902 = vpow2.f32 %v1367_v16  ;;  %v2421_v18 = vadd.f32 %v1660_v17, %v2410_v11  ;;  %v497_v19 = vpop.f32.mrb[19].mxu1 }
 0x165   :  { %1904 = vpow2.f32 %v1366_v9  ;;  %v2424_v20 = vadd.f32 %v2410_v11, %v497_v19 }
 0x166   :  { %v1369_v21 = vmul.f32 -1.442695, %v2421_v18 }
 0x167   :  { %v1368_v22 = vmul.f32 -1.442695, %v2424_v20  ;;  %v1663_v23 = vpop.f32.mrb[20].mxu1 }
 0x168   :  { %1906 = vpow2.f32 %v1369_v21  ;;  %v2429_v24 = vadd.f32 %v1663_v23, %v2410_v11  ;;  %v507_v25 = vpop.f32.mrb[21].mxu1 }
 0x169   :  { %1908 = vpow2.f32 %v1368_v22  ;;  %v2432_v26 = vadd.f32 %v2410_v11, %v507_v25 }
 0x16a   :  { %v1371_v27 = vmul.f32 -1.442695, %v2429_v24 }
 0x16b   :  { %v1370_v28 = vmul.f32 -1.442695, %v2432_v26  ;;  %v1666_v29 = vpop.f32.mrb[22].mxu1 }
 0x16c   :  { %1910 = vpow2.f32 %v1371_v27  ;;  %v2437_v30 = vadd.f32 %v1666_v29, %v2410_v11  ;;  %v517_v31 = vpop.f32.mrb[23].mxu1 }
 0x16d   :  { %1912 = vpow2.f32 %v1370_v28  ;;  %v2440_v32 = vadd.f32 %v2410_v11, %v517_v31 }
 0x16e   :  { %v1903_v33 = vpop.eup %1902  ;;  %v1373_v34 = vmul.f32 -1.442695, %v2437_v30 }
 0x16f   :  { %v1905_v35 = vpop.eup %1904  ;;  %v743_v36 = vadd.f32 1.0, %v1903_v33  ;;  %v1372_v37 = vmul.f32 -1.442695, %v2440_v32  ;;  %v1669_v38 = vpop.f32.mrb[24].mxu1 }
 0x170   :  { %v742_v39 = vadd.f32 1.0, %v1905_v35  ;;  %1914 = vpow2.f32 %v1373_v34  ;;  %v2445_v5 = vadd.f32 %v1669_v38, %v2410_v11  ;;  %v527_v12 = vpop.f32.mrb[25].mxu1 }
 0x171   :  { %1916 = vrcp.f32 %v743_v36  ;;  %v2448_v14 = vadd.f32 %v2410_v11, %v527_v12 }
 0x172   :  { %v1907_v16 = vpop.eup %1906  ;;  %1918 = vrcp.f32 %v742_v39  ;;  %v1375_v9 = vmul.f32 -1.442695, %v2445_v5 }
 0x173   :  { %v1909_v17 = vpop.eup %1908  ;;  %v745_v19 = vadd.f32 1.0, %v1907_v16  ;;  %1920 = vpow2.f32 %v1372_v37  ;;  %v1374_v21 = vmul.f32 -1.442695, %v2448_v14  ;;  %v1672_v22 = vpop.f32.mrb[26].mxu1 }
 0x174   :  { %v744_v23 = vadd.f32 1.0, %v1909_v17  ;;  %1922 = vpow2.f32 %v1375_v9  ;;  %v2453_v25 = vadd.f32 %v1672_v22, %v2410_v11  ;;  %v537_v27 = vpop.f32.mrb[27].mxu1  ;;  %v245_v17 = vadd.f32 %v2339_v41, %v2396_v4 }
 0x175   :  { %1924 = vrcp.f32 %v745_v19  ;;  %v2456_v28 = vadd.f32 %v2410_v11, %v537_v27  ;;  %v240_v27 = vadd.f32 %v2396_v4, %v2343_v43 }
 0x176   :  { %v1911_v29 = vpop.eup %1910  ;;  %1926 = vrcp.f32 %v744_v23  ;;  %v1377_v31 = vmul.f32 -1.442695, %v2453_v25 }
 0x177   :  { %v1913_v33 = vpop.eup %1912  ;;  %v747_v34 = vadd.f32 1.0, %v1911_v29  ;;  %1928 = vpow2.f32 %v1374_v21  ;;  %v1376_v35 = vmul.f32 -1.442695, %v2456_v28  ;;  %v1675_v36 = vpop.f32.mrb[28].mxu1 }
 0x178   :  { %v746_v37 = vadd.f32 1.0, %v1913_v33  ;;  %1930 = vpow2.f32 %v1377_v31  ;;  %v2461_v38 = vadd.f32 %v1675_v36, %v2410_v11  ;;  %v547_v39 = vpop.f32.mrb[29].mxu1 }
 0x179   :  { %1932 = vrcp.f32 %v747_v34  ;;  %v2464_v12 = vadd.f32 %v2410_v11, %v547_v39 }
 0x17a   :  { %v1915_v16 = vpop.eup %1914  ;;  %1934 = vrcp.f32 %v746_v37  ;;  %v1379_v9 = vmul.f32 -1.442695, %v2461_v38  ;;  %v255_v37 = vadd.f32 %v2347_v45, %v2396_v4 }
 0x17b   :  { %v1917_v19 = vpop.eup %1916  ;;  %v749_v21 = vadd.f32 1.0, %v1915_v16  ;;  %1936 = vpow2.f32 %v1376_v35  ;;  %v1378_v22 = vmul.f32 -1.442695, %v2464_v12  ;;  %v1678_v23 = vpop.f32.mrb[30].mxu1 }
 0x17c   :  { %v1919_v29 = vpop.eup %1918  ;;  %v839_v31 = vmul.f32 %v1917_v19, %v2413_v13  ;;  %1938 = vpow2.f32 %v1379_v9  ;;  %v2474_v33 = vadd.f32 %v1678_v23, %v2410_v11  ;;  %v557_v34 = vpop.f32.mrb[31].mxu1 }
 0x17d   :  { %v1921_v36 = vpop.eup %1920  ;;  %v838_v41 = vmul.f32 %v1919_v29, %v2416_v15  ;;  %1940 = vrcp.f32 %v749_v21  ;;  %v2478_v35 = vadd.f32 %v2410_v11, %v557_v34  ;;  %v250_v15 = vadd.f32 %v2396_v4, %v2351_v47 }
 0x17e   :  { %v1923_v39 = vpop.eup %1922  ;;  %v748_v43 = vadd.f32 1.0, %v1921_v36  ;;  %1942 = vpow2.f32 %v1378_v22  ;;  %v871_v16 = vmul.f32 %v839_v31, %v245_v17  ;;  %v1381_v13 = vmul.f32 -1.442695, %v2474_v33 }
 0x17f   :  { %v1925_v9 = vpop.eup %1924  ;;  %v751_v19 = vadd.f32 1.0, %v1923_v39  ;;  %v870_v23 = vmul.f32 %v838_v41, %v240_v27  ;;  %v1380_v8 = vmul.f32 -1.442695, %v2478_v35  ;;  %v1681_v7 = vpop.f32.mrb[32].mxu1  ;;  %v265_v17 = vadd.f32 %v2355_v49, %v2396_v4 }
 0x180   :  { %v1927_v21 = vpop.eup %1926  ;;  %v841_v29 = vmul.f32 %v1925_v9, %v2421_v18  ;;  %1944 = vrcp.f32 %v748_v43  ;;  %v2488_v45 = vadd.f32 %v1681_v7, %v2410_v11  ;;  %v567_v22 = vpop.f32.mrb[33].mxu1  ;;  %v260_v47 = vadd.f32 %v2396_v4, %v2359_v51 }
 0x181   :  { %v1929_v31 = vpop.eup %1928  ;;  %v840_v27 = vmul.f32 %v1927_v21, %v2424_v20  ;;  %1946 = vrcp.f32 %v751_v19  ;;  %v2494_v34 = vadd.f32 %v2410_v11, %v567_v22  ;;  %1735 = vmatprep.mubr.f32.mxu0 %v870_v23 }
 0x182   :  { %v1931_v18 = vpop.eup %1930  ;;  %v750_v36 = vadd.f32 1.0, %v1929_v31  ;;  %1948 = vpow2.f32 %v1381_v13  ;;  %v873_v7 = vmul.f32 %v841_v29, %v255_v37  ;;  %v1383_v41 = vmul.f32 -1.442695, %v2488_v45  ;;  %1736 = vmatmul.mubr.f32.vlgmr.msra.gmra.mrb[16].mxu0 %v871_v16 }
 0x183   :  { %v1933_v39 = vpop.eup %1932  ;;  %v753_v49 = vadd.f32 1.0, %v1931_v18  ;;  %1950 = vpow2.f32 %v1380_v8  ;;  %v872_v43 = vmul.f32 %v840_v27, %v250_v15  ;;  %v1382_v20 = vmul.f32 -1.442695, %v2494_v34  ;;  %v1684_v9 = vpop.f32.mrb[34].mxu1 }
 0x184   :  { %v1935_v19 = vpop.eup %1934  ;;  %v843_v23 = vmul.f32 %v1933_v39, %v2429_v24  ;;  %1952 = vrcp.f32 %v750_v36  ;;  %v2502_v51 = vadd.f32 %v1684_v9, %v2410_v11  ;;  %v577_v21 = vpop.f32.mrb[35].mxu1  ;;  %v275_v8 = vadd.f32 %v2363_v53, %v2396_v4 }
 0x185   :  { %v1937_v13 = vpop.eup %1936  ;;  %v842_v37 = vmul.f32 %v1935_v19, %v2432_v26  ;;  %1954 = vrcp.f32 %v753_v49  ;;  %v2506_v16 = vadd.f32 %v2410_v11, %v577_v21  ;;  %1738 = vmatprep.mubr.f32.mxu0 %v872_v43  ;;  %v285_v9 = vadd.f32 %v2371_v57, %v2396_v4 }
 0x186   :  { %v1939_v15 = vpop.eup %1938  ;;  %v752_v29 = vadd.f32 1.0, %v1937_v13  ;;  %1956 = vpow2.f32 %v1383_v41  ;;  %v875_v24 = vmul.f32 %v843_v23, %v265_v17  ;;  %v1385_v22 = vmul.f32 -1.442695, %v2502_v51  ;;  %1739 = vmatmul.mubr.f32.gmra.mrb[18].mxu0 %v873_v7 }
 0x187   :  { %v1941_v31 = vpop.eup %1940  ;;  %v755_v27 = vadd.f32 1.0, %v1939_v15  ;;  %1958 = vpow2.f32 %v1382_v20  ;;  %v874_v18 = vmul.f32 %v842_v37, %v260_v47  ;;  %v1687_v26 = vpop.f32.mrb[36].mxu1  ;;  %v1384_v49 = vmul.f32 -1.442695, %v2506_v16 }
 0x188   :  { %v1943_v36 = vpop.eup %1942  ;;  %v845_v39 = vmul.f32 %v1941_v31, %v2437_v30  ;;  %1960 = vrcp.f32 %v752_v29  ;;  %v2514_v53 = vadd.f32 %v1687_v26, %v2410_v11  ;;  %v587_v43 = vpop.f32.mrb[37].mxu1  ;;  %v270_v7 = vadd.f32 %v2396_v4, %v2367_v55 }
 0x189   :  { %1962 = vrcp.f32 %v755_v27  ;;  %v754_v17 = vadd.f32 1.0, %v1943_v36  ;;  %v2519_v41 = vadd.f32 %v2410_v11, %v587_v43  ;;  %1741 = vmatprep.mubr.f32.mxu0 %v874_v18  ;;  %v280_v13 = vadd.f32 %v2396_v4, %v2375_v59 }
 0x18a   :  { %v1945_v47 = vpop.eup %1944  ;;  %1964 = vpow2.f32 %v1385_v22  ;;  %v877_v20 = vmul.f32 %v845_v39, %v275_v8  ;;  %v1387_v30 = vmul.f32 -1.442695, %v2514_v53  ;;  %1742 = vmatmul.mubr.f32.gmra.mrb[20].mxu0 %v875_v24  ;;  %v295_v57 = vadd.f32 %v2379_v61, %v2396_v4 }
 0x18b   :  { %v1947_v19 = vpop.eup %1946  ;;  %v844_v23 = vmul.f32 %v1945_v47, %v2440_v32  ;;  %1966 = vrcp.f32 %v754_v17  ;;  %v1386_v21 = vmul.f32 -1.442695, %v2519_v41  ;;  %v1690_v55 = vpop.f32.mrb[38].mxu1 }
 0x18c   :  { %v1949_v37 = vpop.eup %1948  ;;  %v847_v15 = vmul.f32 %v1947_v19, %v2445_v5  ;;  %1968 = vpow2.f32 %v1384_v49  ;;  %v2530_v8 = vadd.f32 %v1690_v55, %v2410_v11  ;;  %v597_v29 = vpop.f32.mrb[39].mxu1  ;;  %v290_v49 = vadd.f32 %v2396_v4, %v2383_v63 }
 0x18d   :  { %v1951_v24 = vpop.eup %1950  ;;  %v757_v32 = vadd.f32 1.0, %v1949_v37  ;;  %1970 = vpow2.f32 %v1387_v30  ;;  %v876_v22 = vmul.f32 %v844_v23, %v270_v7  ;;  %v2535_v31 = vadd.f32 %v2410_v11, %v597_v29 }
 0x18e   :  { %v1953_v27 = vpop.eup %1952  ;;  %v756_v59 = vadd.f32 1.0, %v1951_v24  ;;  %1972 = vpow2.f32 %v1386_v21  ;;  %v879_v18 = vmul.f32 %v847_v15, %v285_v9  ;;  %v1389_v5 = vmul.f32 -1.442695, %v2530_v8 }
 0x18f   :  { %v1955_v26 = vpop.eup %1954  ;;  %v846_v36 = vmul.f32 %v1953_v27, %v2448_v14  ;;  %1974 = vrcp.f32 %v757_v32  ;;  %v1388_v39 = vmul.f32 -1.442695, %v2535_v31  ;;  %1744 = vmatprep.mubr.f32.mxu0 %v876_v22  ;;  %v1693_v61 = vpop.f32.mrb[40].mxu1  ;;  %v305_v14 = vadd.f32 %v2387_v1, %v2396_v4 }
 0x190   :  { %v1957_v43 = vpop.eup %1956  ;;  %v849_v17 = vmul.f32 %v1955_v26, %v2453_v25  ;;  %1976 = vrcp.f32 %v756_v59  ;;  %1745 = vmatmul.mubr.f32.gmra.mrb[22].mxu0 %v877_v20  ;;  %v2544_v7 = vadd.f32 %v1693_v61, %v2410_v11  ;;  %v607_v47 = vpop.f32.mrb[41].mxu1  ;;  %v315_v61 = vadd.f32 %v2398_v6, %v2396_v4 }
 0x191   :  { %v1959_v30 = vpop.eup %1958  ;;  %v759_v9 = vadd.f32 1.0, %v1957_v43  ;;  %1978 = vpow2.f32 %v1389_v5  ;;  %v878_v19 = vmul.f32 %v846_v36, %v280_v13  ;;  %v2549_v23 = vadd.f32 %v2410_v11, %v607_v47 }
 0x192   :  { %v1961_v63 = vpop.eup %1960  ;;  %v758_v21 = vadd.f32 1.0, %v1959_v30  ;;  %1980 = vpow2.f32 %v1388_v39  ;;  %v881_v25 = vmul.f32 %v849_v17, %v295_v57  ;;  %v1391_v20 = vmul.f32 -1.442695, %v2544_v7 }
 0x193   :  { %v1963_v55 = vpop.eup %1962  ;;  %v848_v37 = vmul.f32 %v1961_v63, %v2456_v28  ;;  %1982 = vrcp.f32 %v759_v9  ;;  %v1390_v15 = vmul.f32 -1.442695, %v2549_v23  ;;  %1747 = vmatprep.mubr.f32.mxu0 %v878_v19  ;;  %v1696_v1 = vpop.f32.mrb[42].mxu1  ;;  %v300_v57 = vadd.f32 %v2396_v4, %v2391_v3 }
 0x194   :  { %v1965_v29 = vpop.eup %1964  ;;  %v851_v13 = vmul.f32 %v1963_v55, %v2461_v38  ;;  %1984 = vrcp.f32 %v758_v21  ;;  %1748 = vmatmul.mubr.f32.gmra.mrb[24].mxu0 %v879_v18  ;;  %v2556_v24 = vadd.f32 %v1696_v1, %v2410_v11  ;;  %v617_v32 = vpop.f32.mrb[43].mxu1  ;;  %v310_v19 = vadd.f32 %v2396_v4, %v2405_v10 }
 0x195   :  { %v1967_v22 = vpop.eup %1966  ;;  %v761_v27 = vadd.f32 1.0, %v1965_v29  ;;  %1986 = vpow2.f32 %v1391_v20  ;;  %v880_v28 = vmul.f32 %v848_v37, %v290_v49  ;;  %v2561_v59 = vadd.f32 %v2410_v11, %v617_v32 }
 0x196   :  { %v1969_v5 = vpop.eup %1968  ;;  %v850_v26 = vmul.f32 %v1967_v22, %v2464_v12  ;;  %1988 = vpow2.f32 %v1390_v15  ;;  %v883_v38 = vmul.f32 %v851_v13, %v305_v14  ;;  %v1393_v18 = vmul.f32 -1.442695, %v2556_v24 }
 0x197   :  { %v1971_v36 = vpop.eup %1970  ;;  %1990 = vrcp.f32 %v761_v27  ;;  %v760_v39 = vadd.f32 1.0, %v1969_v5  ;;  %v1392_v3 = vmul.f32 -1.442695, %v2561_v59  ;;  %1750 = vmatprep.mubr.f32.mxu0 %v880_v28  ;;  %v1699_v49 = vpop.f32.mrb[44].mxu1  ;;  %v325_v28 = vadd.f32 %v2337_v40, %v2396_v4 }
 0x198   :  { %v1973_v43 = vpop.eup %1972  ;;  %v763_v17 = vadd.f32 1.0, %v1971_v36  ;;  %1992 = vpow2.f32 %v1393_v18  ;;  %v882_v47 = vmul.f32 %v850_v26, %v300_v57  ;;  %1751 = vmatmul.mubr.f32.gmra.mrb[26].mxu0 %v881_v25  ;;  %v2569_v12 = vadd.f32 %v1699_v49, %v2410_v11  ;;  %v627_v14 = vpop.f32.mrb[45].mxu1 }
 0x199   :  { %v1975_v30 = vpop.eup %1974  ;;  %1994 = vrcp.f32 %v760_v39  ;;  %v762_v9 = vadd.f32 1.0, %v1973_v43  ;;  %v2574_v63 = vadd.f32 %v2410_v11, %v627_v14  ;;  %v320_v18 = vadd.f32 %v2396_v4, %v2341_v42 }
 0x19a   :  { %v1977_v6 = vpop.eup %1976  ;;  %v853_v21 = vmul.f32 %v1975_v30, %v2474_v33  ;;  %1996 = vrcp.f32 %v763_v17  ;;  %v1395_v20 = vmul.f32 -1.442695, %v2569_v12  ;;  %1753 = vmatprep.mubr.f32.mxu0 %v882_v47  ;;  %v335_v17 = vadd.f32 %v2345_v44, %v2396_v4 }
 0x19b   :  { %v1979_v25 = vpop.eup %1978  ;;  %v852_v55 = vmul.f32 %v1977_v6, %v2478_v35  ;;  %1998 = vrcp.f32 %v762_v9  ;;  %v1394_v37 = vmul.f32 -1.442695, %v2574_v63  ;;  %v1702_v15 = vpop.f32.mrb[46].mxu1  ;;  %v330_v30 = vadd.f32 %v2396_v4, %v2349_v46 }
 0x19c   :  { %v1981_v1 = vpop.eup %1980  ;;  %v765_v29 = vadd.f32 1.0, %v1979_v25  ;;  %2000 = vpow2.f32 %v1392_v3  ;;  %v885_v10 = vmul.f32 %v853_v21, %v315_v61  ;;  %1754 = vmatmul.mubr.f32.gmra.mrb[28].mxu0 %v883_v38  ;;  %v2581_v13 = vadd.f32 %v1702_v15, %v2410_v11  ;;  %v637_v33 = vpop.f32.mrb[47].mxu1 }
 0x19d   :  { %v1983_v57 = vpop.eup %1982  ;;  %v764_v32 = vadd.f32 1.0, %v1981_v1  ;;  %2002 = vpow2.f32 %v1395_v20  ;;  %v884_v22 = vmul.f32 %v852_v55, %v310_v19  ;;  %v2584_v27 = vadd.f32 %v2410_v11, %v637_v33 }
 0x19e   :  { %v1985_v35 = vpop.eup %1984  ;;  %v855_v5 = vmul.f32 %v1983_v57, %v2488_v45  ;;  %2004 = vrcp.f32 %v765_v29  ;;  %v1397_v26 = vmul.f32 -1.442695, %v2581_v13  ;;  %v345_v44 = vadd.f32 %v2353_v48, %v2396_v4 }
 0x19f   :  { %v1987_v38 = vpop.eup %1986  ;;  %v854_v36 = vmul.f32 %v1985_v35, %v2494_v34  ;;  %2006 = vrcp.f32 %v764_v32  ;;  %1756 = vmatprep.mubr.f32.mxu0 %v884_v22  ;;  %v1396_v3 = vmul.f32 -1.442695, %v2584_v27  ;;  %v340_v20 = vadd.f32 %v2396_v4, %v2357_v50 }
 0x1a0   :  { %v1989_v39 = vpop.eup %1988  ;;  %v767_v11 = vadd.f32 1.0, %v1987_v38  ;;  %2008 = vpow2.f32 %v1394_v37  ;;  %1757 = vmatmul.mubr.f32.gmra.mrb[30].mxu0 %v885_v10  ;;  %v887_v40 = vmul.f32 %v855_v5, %v325_v28  ;;  %v355_v48 = vadd.f32 %v2361_v52, %v2396_v4 }
 0x1a1   :  { %v1991_v61 = vpop.eup %1990  ;;  %v766_v45 = vadd.f32 1.0, %v1989_v39  ;;  %2010 = vpow2.f32 %v1397_v26  ;;  %v886_v49 = vmul.f32 %v854_v36, %v320_v18  ;;  %v350_v50 = vadd.f32 %v2396_v4, %v2365_v54 }
 0x1a2   :  { %v1993_v43 = vpop.eup %1992  ;;  %v857_v42 = vmul.f32 %v1991_v61, %v2502_v51  ;;  %2012 = vrcp.f32 %v767_v11  ;;  %v365_v52 = vadd.f32 %v2369_v56, %v2396_v4  ;;  %v360_v54 = vadd.f32 %v2396_v4, %v2373_v58 }
 0x1a3   :  { %v1995_v34 = vpop.eup %1994  ;;  %2014 = vrcp.f32 %v766_v45  ;;  %v769_v47 = vadd.f32 1.0, %v1993_v43  ;;  %1759 = vmatprep.mubr.f32.mxu0 %v886_v49  ;;  %v375_v11 = vadd.f32 %v2377_v60, %v2396_v4  ;;  %v370_v58 = vadd.f32 %v2396_v4, %v2381_v62 }
 0x1a4   :  { %v1997_v14 = vpop.eup %1996  ;;  %v856_v9 = vmul.f32 %v1995_v34, %v2506_v16  ;;  %2016 = vpow2.f32 %v1396_v3  ;;  %1760 = vmatmul.mubr.f32.gmra.mrb[32].mxu0 %v887_v40  ;;  %v889_v19 = vmul.f32 %v857_v42, %v335_v17  ;;  %v385_v45 = vadd.f32 %v2385_v0, %v2396_v4 }
 0x1a5   :  { %v1999_v6 = vpop.eup %1998  ;;  %v859_v51 = vmul.f32 %v1997_v14, %v2514_v53  ;;  %2018 = vrcp.f32 %v769_v47  ;;  %v380_v42 = vadd.f32 %v2396_v4, %v2389_v2  ;;  %v2697_v14 = vld [vmem:[#allocation16_spill] sm:$0xff] }
 0x1a6   :  { %v2001_v21 = vpop.eup %2000  ;;  %v858_v25 = vmul.f32 %v1999_v6, %v2519_v41  ;;  %v888_v55 = vmul.f32 %v856_v9, %v330_v30  ;;  %v2698_v30 = vld [vmem:[#allocation17_spill] sm:$0xff]  ;;  %v2638_v2 = vld [vmem:[%s2693_s6] ss:$0 sm:$0xff]  ;;  %s2154_s6 = smov [#allocation11]  }
 0x1a7   :  { %v2003_v46 = vpop.eup %2002  ;;  %v768_v37 = vadd.f32 1.0, %v2001_v21  ;;  %v891_v16 = vmul.f32 %v859_v51, %v345_v44  ;;  %s1350_s30 = sshll.u32 %s2154_s6, 4  ;;  %s1351_s30 = int_to_ptr.vmem [resolvable:$true] %s1350_s30 }
 0x1a8   :  { %v2005_v15 = vpop.eup %2004  ;;  %v771_v1 = vadd.f32 1.0, %v2003_v46  ;;  %1762 = vmatprep.mubr.f32.mxu0 %v888_v55  ;;  %v890_v29 = vmul.f32 %v858_v25, %v340_v20  ;;  %s2118_s8 = scalar_lea.vmem %s1351_s30, 4096  ;;  %p2123_p5 = scmp.lt.s32.totalorder %s1351_s30, %s1351_s30 }
 0x1a9   :  { %v2007_v10 = vpop.eup %2006  ;;  %v861_v53 = vmul.f32 %v2005_v15, %v2530_v8  ;;  %2020 = vrcp.f32 %v768_v37  ;;  %1763 = vmatmul.mubr.f32.gmra.mrb[34].mxu0 %v889_v19  ;;  %p2119_p4 = scmp.ne.s32.totalorder %s1351_s30, %s2118_s8  ;;  %p2124_p6 = scmp.lt.s32.totalorder %s2118_s8, %s2118_s8 }
 0x1aa   :  { %v2009_v33 = vpop.eup %2008  ;;  %v860_v41 = vmul.f32 %v2007_v10, %v2535_v31  ;;  %2022 = vrcp.f32 %v771_v1  ;;  %1765 = vmatprep.mubr.f32.mxu0 %v890_v29 }
 0x1ab   :  { %v2011_v57 = vpop.eup %2010  ;;  %v770_v32 = vadd.f32 1.0, %v2009_v33  ;;  %v893_v22 = vmul.f32 %v861_v53, %v355_v48  ;;  %p2125_p7 = por %p2124_p6, %p2123_p5 }
 0x1ac   :  { %v2013_v35 = vpop.eup %2012  ;;  %v773_v28 = vadd.f32 1.0, %v2011_v57  ;;  %v892_v5 = vmul.f32 %v860_v41, %v350_v50 }
 0x1ad   :  { %v2015_v26 = vpop.eup %2014  ;;  %v863_v8 = vmul.f32 %v2013_v35, %v2544_v7  ;;  %2024 = vrcp.f32 %v770_v32  ;;  %1766 = vmatmul.mubr.f32.gmra.mrb[36].mxu0 %v891_v16  ;;  %p2126_p8 = pnand %p2125_p7, %p2119_p4 }
 0x1ae   :  { %v2017_v38 = vpop.eup %2016  ;;  %v862_v31 = vmul.f32 %v2015_v26, %v2549_v23  ;;  %2026 = vrcp.f32 %v773_v28  ;;  %1768 = vmatprep.mubr.f32.mxu0 %v892_v5 }
 0x1af   :  { %v2019_v18 = vpop.eup %2018  ;;  %v772_v36 = vadd.f32 1.0, %v2017_v38  ;;  %v895_v39 = vmul.f32 %v863_v8, %v365_v52 }
 0x1b0   :  { %v865_v56 = vmul.f32 %v2019_v18, %v2556_v24  ;;  %v894_v3 = vmul.f32 %v862_v31, %v360_v54 }
 0x1b1   :  { %2028 = vrcp.f32 %v772_v36  ;;  %1769 = vmatmul.mubr.f32.gmra.mrb[38].mxu0 %v893_v22 }
 0x1b2   :  { %1771 = vmatprep.mubr.f32.mxu0 %v894_v3  ;;  %v897_v7 = vmul.f32 %v865_v56, %v375_v11 }
 0x1b3   :  { %v2021_v40 = vpop.eup %2020 }
 0x1b4   :  { %v2023_v61 = vpop.eup %2022  ;;  %v864_v23 = vmul.f32 %v2021_v40, %v2561_v59 }
 0x1b5   :  { %v867_v49 = vmul.f32 %v2023_v61, %v2569_v12  ;;  %1772 = vmatmul.mubr.f32.gmra.mrb[40].mxu0 %v895_v39  ;;  %v390_v12 = vadd.f32 %v2396_v4, %v2698_v30 }
 0x1b6   :  { %v896_v60 = vmul.f32 %v864_v23, %v370_v58 }
 0x1b7   :  { %v2025_v24 = vpop.eup %2024  ;;  %v899_v43 = vmul.f32 %v867_v49, %v385_v45 }
 0x1b8   :  { %v2027_v17 = vpop.eup %2026  ;;  %v866_v34 = vmul.f32 %v2025_v24, %v2574_v63  ;;  %1774 = vmatprep.mubr.f32.mxu0 %v896_v60 }
 0x1b9   :  { %v869_v62 = vmul.f32 %v2027_v17, %v2581_v13  ;;  %1775 = vmatmul.mubr.f32.gmra.mrb[42].mxu0 %v897_v7 }
 0x1ba   :  { %v898_v59 = vmul.f32 %v866_v34, %v380_v42 }
 0x1bb   :  { %v2029_v47 = vpop.eup %2028  ;;  %v901_v0 = vmul.f32 %v869_v62, %v2697_v14 }
 0x1bc   :  { %v868_v9 = vmul.f32 %v2029_v47, %v2584_v27  ;;  %1777 = vmatprep.mubr.f32.mxu0 %v898_v59 }
 0x1bd   :  { %1778 = vmatmul.mubr.f32.gmra.mrb[44].mxu0 %v899_v43 }
 0x1be   :  { %v900_v19 = vmul.f32 %v868_v9, %v390_v12 }
 0x1c0   :  { %1780 = vmatprep.mubr.f32.mxu0 %v900_v19 }
 0x1c1   :  { %1781 = vmatmul.mubr.f32.gmra.mrb[46].mxu0 %v901_v0 }
 0x255   :  { %v1737_v63 = vpop.f32.mrb[16].mxu0 }
 0x256   :  { %v1282_v13 = vadd.f32 %v1737_v63, %v2638_v2  ;;  %v1016_v6 = vpop.f32.mrb[17].mxu0 }
 0x257   :  { %v1281_v44 = vadd.f32 %v2638_v2, %v1016_v6 }
 0x258   :  { %1314 = vst [vmem:[#allocation11 + $0x8] sm:$0xff] %v1282_v13 }
 0x259   :  { %1313 = vst [vmem:[#allocation11] sm:$0xff] %v1281_v44  ;;  %v1740_v4 = vpop.f32.mrb[18].mxu0 }
 0x25a   :  { %v1284_v27 = vadd.f32 %v1740_v4, %v2638_v2  ;;  %v1026_v51 = vpop.f32.mrb[19].mxu0 }
 0x25b   :  { %v1283_v21 = vadd.f32 %v2638_v2, %v1026_v51 }
 0x25c   :  { %1316 = vst [vmem:[#allocation11 + $0x18] sm:$0xff] %v1284_v27 }
 0x25d   :  { %1315 = vst [vmem:[#allocation11 + $0x10] sm:$0xff] %v1283_v21  ;;  %v1743_v20 = vpop.f32.mrb[20].mxu0 }
 0x25e   :  { %v1286_v25 = vadd.f32 %v1743_v20, %v2638_v2  ;;  %v1036_v55 = vpop.f32.mrb[21].mxu0 }
 0x25f   :  { %v1285_v46 = vadd.f32 %v2638_v2, %v1036_v55 }
 0x260   :  { %1318 = vst [vmem:[#allocation11 + $0x28] sm:$0xff] %v1286_v25 }
 0x261   :  { %1317 = vst [vmem:[#allocation11 + $0x20] sm:$0xff] %v1285_v46 }
 0x263   :  { %v1746_v37 = vpop.f32.mrb[22].mxu0 }
 0x264   :  { %v1288_v16 = vadd.f32 %v1746_v37, %v2638_v2  ;;  %v1046_v15 = vpop.f32.mrb[23].mxu0 }
 0x265   :  { %v1287_v1 = vadd.f32 %v2638_v2, %v1046_v15 }
 0x266   :  { %1320 = vst [vmem:[#allocation11 + $0x38] sm:$0xff] %v1288_v16 }
 0x267   :  { %1319 = vst [vmem:[#allocation11 + $0x30] sm:$0xff] %v1287_v1  ;;  %v1749_v29 = vpop.f32.mrb[24].mxu0 }
 0x268   :  { %v1290_v10 = vadd.f32 %v1749_v29, %v2638_v2  ;;  %v1056_v48 = vpop.f32.mrb[25].mxu0 }
 0x269   :  { %v1289_v53 = vadd.f32 %v2638_v2, %v1056_v48 }
 0x26a   :  { %1322 = vst [vmem:[#allocation11 + $0x48] sm:$0xff] %v1290_v10 }
 0x26b   :  { %1321 = vst [vmem:[#allocation11 + $0x40] sm:$0xff] %v1289_v53  ;;  %v1752_v33 = vpop.f32.mrb[26].mxu0 }
 0x26c   :  { %v1292_v50 = vadd.f32 %v1752_v33, %v2638_v2  ;;  %v1066_v41 = vpop.f32.mrb[27].mxu0 }
 0x26d   :  { %v1291_v57 = vadd.f32 %v2638_v2, %v1066_v41 }
 0x26e   :  { %1324 = vst [vmem:[#allocation11 + $0x58] sm:$0xff] %v1292_v50 }
 0x26f   :  { %1323 = vst [vmem:[#allocation11 + $0x50] sm:$0xff] %v1291_v57  ;;  %v1755_v32 = vpop.f32.mrb[28].mxu0 }
 0x270   :  { %v1294_v22 = vadd.f32 %v1755_v32, %v2638_v2  ;;  %v1076_v35 = vpop.f32.mrb[29].mxu0 }
 0x271   :  { %v1293_v28 = vadd.f32 %v2638_v2, %v1076_v35 }
 0x272   :  { %1326 = vst [vmem:[#allocation11 + $0x68] sm:$0xff] %v1294_v22 }
 0x273   :  { %1325 = vst [vmem:[#allocation11 + $0x60] sm:$0xff] %v1293_v28  ;;  %v1758_v5 = vpop.f32.mrb[30].mxu0 }
 0x274   :  { %v1296_v26 = vadd.f32 %v1758_v5, %v2638_v2  ;;  %v1086_v52 = vpop.f32.mrb[31].mxu0 }
 0x275   :  { %v1295_v8 = vadd.f32 %v2638_v2, %v1086_v52 }
 0x276   :  { %1328 = vst [vmem:[#allocation11 + $0x78] sm:$0xff] %v1296_v26 }
 0x277   :  { %1327 = vst [vmem:[#allocation11 + $0x70] sm:$0xff] %v1295_v8  ;;  %v1761_v38 = vpop.f32.mrb[32].mxu0 }
 0x278   :  { %v1298_v54 = vadd.f32 %v1761_v38, %v2638_v2  ;;  %v1096_v31 = vpop.f32.mrb[33].mxu0 }
 0x279   :  { %v1297_v18 = vadd.f32 %v2638_v2, %v1096_v31 }
 0x27a   :  { %1330 = vst [vmem:[#allocation11 + $0x88] sm:$0xff] %v1298_v54 }
 0x27b   :  { %1329 = vst [vmem:[#allocation11 + $0x80] sm:$0xff] %v1297_v18 }
 0x27c   :  { %v1764_v36 = vpop.f32.mrb[34].mxu0 }
 0x27d   :  { %v1300_v39 = vadd.f32 %v1764_v36, %v2638_v2  ;;  %v1106_v11 = vpop.f32.mrb[35].mxu0 }
 0x27e   :  { %v1299_v56 = vadd.f32 %v2638_v2, %v1106_v11 }
 0x27f   :  { %1332 = vst [vmem:[#allocation11 + $0x98] sm:$0xff] %v1300_v39 }
 0x280   :  { %1331 = vst [vmem:[#allocation11 + $0x90] sm:$0xff] %v1299_v56  ;;  %v1767_v3 = vpop.f32.mrb[36].mxu0 }
 0x281   :  { %v1302_v7 = vadd.f32 %v1767_v3, %v2638_v2  ;;  %v1116_v40 = vpop.f32.mrb[37].mxu0 }
 0x282   :  { %v1301_v61 = vadd.f32 %v2638_v2, %v1116_v40 }
 0x283   :  { %1334 = vst [vmem:[#allocation11 + $0xa8] sm:$0xff] %v1302_v7 }
 0x284   :  { %1333 = vst [vmem:[#allocation11 + $0xa0] sm:$0xff] %v1301_v61  ;;  %v1770_v58 = vpop.f32.mrb[38].mxu0 }
 0x285   :  { %v1304_v23 = vadd.f32 %v1770_v58, %v2638_v2  ;;  %v1126_v45 = vpop.f32.mrb[39].mxu0 }
 0x286   :  { %v1303_v49 = vadd.f32 %v2638_v2, %v1126_v45 }
 0x287   :  { %1336 = vst [vmem:[#allocation11 + $0xb8] sm:$0xff] %v1304_v23 }
 0x288   :  { %1335 = vst [vmem:[#allocation11 + $0xb0] sm:$0xff] %v1303_v49  ;;  %v1773_v60 = vpop.f32.mrb[40].mxu0 }
 0x289   :  { %v1306_v24 = vadd.f32 %v1773_v60, %v2638_v2  ;;  %v1136_v43 = vpop.f32.mrb[41].mxu0 }
 0x28a   :  { %v1305_v17 = vadd.f32 %v2638_v2, %v1136_v43 }
 0x28b   :  { %1338 = vst [vmem:[#allocation11 + $0xc8] sm:$0xff] %v1306_v24 }
 0x28c   :  { %1337 = vst [vmem:[#allocation11 + $0xc0] sm:$0xff] %v1305_v17  ;;  %v1776_v42 = vpop.f32.mrb[42].mxu0 }
 0x28d   :  { %v1308_v34 = vadd.f32 %v1776_v42, %v2638_v2  ;;  %v1146_v62 = vpop.f32.mrb[43].mxu0 }
 0x28e   :  { %v1307_v59 = vadd.f32 %v2638_v2, %v1146_v62 }
 0x28f   :  { %1340 = vst [vmem:[#allocation11 + $0xd8] sm:$0xff] %v1308_v34 }
 0x290   :  { %1339 = vst [vmem:[#allocation11 + $0xd0] sm:$0xff] %v1307_v59  ;;  %v1779_v47 = vpop.f32.mrb[44].mxu0 }
 0x291   :  { %v1310_v14 = vadd.f32 %v1779_v47, %v2638_v2  ;;  %v1156_v0 = vpop.f32.mrb[45].mxu0 }
 0x292   :  { %v1309_v30 = vadd.f32 %v2638_v2, %v1156_v0 }
 0x293   :  { %1342 = vst [vmem:[#allocation11 + $0xe8] sm:$0xff] %v1310_v14 }
 0x294   :  { %1341 = vst [vmem:[#allocation11 + $0xe0] sm:$0xff] %v1309_v30  ;;  %v1782_v12 = vpop.f32.mrb[46].mxu0 }
 0x295   :  { %v1312_v9 = vadd.f32 %v1782_v12, %v2638_v2  ;;  %v1166_v19 = vpop.f32.mrb[47].mxu0 }
 0x296   :  { %v1311_v63 = vadd.f32 %v2638_v2, %v1166_v19 }
 0x297   :  { %1344 = vst [vmem:[#allocation11 + $0xf8] sm:$0xff] %v1312_v9 }
 0x298   :  { %1343 = vst [vmem:[#allocation11 + $0xf0] sm:$0xff] %v1311_v63 }
 0x299   :  { %2129 = shalt.err (!%p2126_p8)
}
 0x29a   :  { %s2130_s11 = scalar_lea.hbm %s2694_s7, 4096 }
 0x29b   :  { %p2131_p9 = scmp.ne.s32.totalorder %s2694_s7, %s2130_s11  ;;  %p2134_p10 = scmp.lt.u32.totalorder %s2130_s11, %s2694_s7 }
 0x29d   :  { %p2136_p11 = pnand %p2134_p10, %p2131_p9 }
 0x29f   :  { %2139 = shalt.err (!%p2136_p11)
}
 0x2a0   :  { %1356 = dma.vmem_to_hbm [thread:$0]  %s1351_s30, 4096, %s2694_s7, [#allocation5], %s2150_s13, %s2150_s13, %s2151_s14  }
 0x2a1   :  { %2146 = dma.done.wait [#allocation5], 4096  }
 0x2a2   :  { %2147 = vsyncadd [#allocation5], 4294963200 }
 0x2a3   :  { %1360 = vsyncpa [#allocation4], 1 }
 0x2a4   :  { %1361 = vsyncpa [#allocation7], 1 }
 0x2a5   :  { %1362 = vsyncpa [#allocation10], 1 }
 0x2a6   :  { %1363 = vsyncpa [#allocation5], 1 }

</bundles_post_ra>
